<compile_context>
chip_gen: v6e
topology: v6e:2x2x1
jax: 0.10.0
libtpu: 0.0.40
codegen_flags: <defaults>
</compile_context>

<pallas_src>
import jax
import jax.numpy as jnp
from jax.experimental import pallas as pl
from jax.experimental.pallas import tpu as pltpu


def _mlp_kernel(x_ref, wfc_ref, bfc_ref, wproj_ref, bproj_ref, o_ref, acc_ref):
    # x_ref:     (tm, D)   row tile (resident across the hidden axis)
    # wfc_ref:   (D, th)   hidden-dim slice of fc weight
    # bfc_ref:   (1, th)
    # wproj_ref: (th, D)   hidden-dim slice of proj weight
    # bproj_ref: (1, D)
    # acc_ref:   (tm, D)   f32 accumulator scratch
    hk = pl.program_id(1)

    @pl.when(hk == 0)
    def _():
        acc_ref[...] = jnp.zeros_like(acc_ref)

    # c_fc partial: MXU matmul in native dtype, f32 accumulation.
    h = jnp.dot(x_ref[...], wfc_ref[...], preferred_element_type=jnp.float32)
    h = h + bfc_ref[...].astype(jnp.float32)

    # GELU(approximate='tanh') in f32: 0.5*h*(1 + tanh(sqrt(2/pi)*(h + 0.044715*h^3)))
    c = 0.7978845608028654  # sqrt(2/pi)
    g = 0.5 * h * (1.0 + jnp.tanh(c * (h + 0.044715 * h * h * h)))

    # c_proj partial: cast GELU back to the input dtype for the MXU, accumulate f32.
    acc_ref[...] += jnp.dot(g.astype(x_ref.dtype), wproj_ref[...],
                            preferred_element_type=jnp.float32)

    @pl.when(hk == pl.num_programs(1) - 1)
    def _():
        o_ref[...] = (acc_ref[...] + bproj_ref[...].astype(jnp.float32)
                      ).astype(o_ref.dtype)


def _round_up(x, m):
    return ((x + m - 1) // m) * m


def mlp_pallas(x, w_fc, b_fc, w_proj, b_proj, *, tm=None, th=None):
    """x: (B, T, D). w_fc: (D, 4D). b_fc: (4D,). w_proj: (4D, D). b_proj: (D,)."""
    B, T, D = x.shape
    H = w_fc.shape[1]
    M = B * T
    x2 = x.reshape(M, D)

    # Row-tile selection: cap it (never tm = M at large sizes) and prefer
    # >= 2 steps along the parallel axis so both v7x TensorCores get work.
    if tm is None:
        tm = min(256, _round_up(M, 8))
        if M > 8 and pl.cdiv(M, tm) < 2:
            tm = max(8, _round_up(pl.cdiv(M, 2), 8))

    # Hidden-dim tile: must divide H exactly (reduction axis) and be a
    # multiple of 128 when possible (lane-dense MXU tiles at real sizes).
    if th is None:
        th = H
        for cand in (512, 256, 128):
            if H % cand == 0:
                th = cand
                break

    grid = (pl.cdiv(M, tm), H // th)

    itm = jnp.dtype(x.dtype).itemsize
    # Double-buffered input tiles + output tile + f32 accumulator + f32
    # intermediates, with headroom; capped at v7x's 64 MiB physical VMEM.
    vmem_bytes = 2 * (tm * D + D * th + th + th * D + D) * itm   # inputs (x2 bufs)
    vmem_bytes += 2 * tm * D * itm                               # output
    vmem_bytes += tm * D * 4                                     # accumulator scratch
    vmem_bytes += 2 * tm * th * 4                                # h / g intermediates
    vmem_limit = min(max(2 * vmem_bytes, 16 << 20), 64 << 20)

    cost = pl.CostEstimate(
        flops=4 * M * D * H,                       # 2*M*D*H per matmul, two matmuls
        transcendentals=M * H,                     # tanh
        bytes_accessed=(2 * M * D + 2 * D * H + H + D) * itm,
    )

    out2 = pl.pallas_call(
        _mlp_kernel,
        out_shape=jax.ShapeDtypeStruct((M, D), x.dtype),
        grid_spec=pltpu.PrefetchScalarGridSpec(
            num_scalar_prefetch=0,
            grid=grid,
            in_specs=[
                pl.BlockSpec((tm, D), lambda i, hk: (i, 0)),    # x tile
                pl.BlockSpec((D, th), lambda i, hk: (0, hk)),   # Wfc slice
                pl.BlockSpec((1, th), lambda i, hk: (0, hk)),   # bfc slice
                pl.BlockSpec((th, D), lambda i, hk: (hk, 0)),   # Wproj slice
                pl.BlockSpec((1, D), lambda i, hk: (0, 0)),     # bproj
            ],
            out_specs=pl.BlockSpec((tm, D), lambda i, hk: (i, 0)),
            scratch_shapes=[pltpu.VMEM((tm, D), jnp.float32)],
        ),
        compiler_params=pltpu.CompilerParams(
            dimension_semantics=("parallel", "arbitrary"),
            vmem_limit_bytes=int(vmem_limit)),
        cost_estimate=cost,
    )(x2, w_fc, b_fc.reshape(1, H), w_proj, b_proj.reshape(1, D))

    return out2.reshape(B, T, D)


def mlp_reference(x, w_fc, b_fc, w_proj, b_proj):
    h = jnp.einsum("btd,dh->bth", x, w_fc) + b_fc
    c = 0.7978845608028654
    g = 0.5 * h * (1.0 + jnp.tanh(c * (h + 0.044715 * h ** 3)))
    return jnp.einsum("bth,hd->btd", g, w_proj) + b_proj


if __name__ == "__main__":
    # Small config consistent with the module: n_embd=32, batch=2, seq=8.
    n_embd = 32
    hidden = 4 * n_embd
    B, T = 2, 8

    key = jax.random.PRNGKey(0)
    kx, k1, k2, k3, k4 = jax.random.split(key, 5)

    x = jax.random.normal(kx, (B, T, n_embd), dtype=jnp.float32)

    # Deterministic parameter init (torch.nn.Linear-like uniform bounds),
    # stored transposed as (in_features, out_features) for the kernel.
    bound_fc = 1.0 / (n_embd ** 0.5)
    w_fc = jax.random.uniform(k1, (n_embd, hidden), minval=-bound_fc,
                              maxval=bound_fc, dtype=jnp.float32)
    b_fc = jax.random.uniform(k2, (hidden,), minval=-bound_fc,
                              maxval=bound_fc, dtype=jnp.float32)

    bound_pr = 1.0 / (hidden ** 0.5)
    w_proj = jax.random.uniform(k3, (hidden, n_embd), minval=-bound_pr,
                                maxval=bound_pr, dtype=jnp.float32)
    b_proj = jax.random.uniform(k4, (n_embd,), minval=-bound_pr,
                                maxval=bound_pr, dtype=jnp.float32)

    out = mlp_pallas(x, w_fc, b_fc, w_proj, b_proj)
    out = jax.block_until_ready(out)

    ref = mlp_reference(x, w_fc, b_fc, w_proj, b_proj)
    assert out.shape == (B, T, n_embd)
    assert jnp.allclose(out, ref, atol=2e-5, rtol=2e-5), "mismatch vs reference"

    print("KERNEL_OK")
</pallas_src>

<mosaic_0001>
module attributes {stable_mosaic.version = 11 : i64} {
  func.func @_mlp_kernel(%arg0: i32, %arg1: i32, %arg2: memref<8x32xf32, #tpu.memory_space<vmem>>, %arg3: memref<32x128xf32, #tpu.memory_space<vmem>>, %arg4: memref<1x128xf32, #tpu.memory_space<vmem>>, %arg5: memref<128x32xf32, #tpu.memory_space<vmem>>, %arg6: memref<1x32xf32, #tpu.memory_space<vmem>>, %arg7: memref<8x32xf32, #tpu.memory_space<vmem>>, %arg8: memref<8x32xf32, #tpu.memory_space<vmem>>) attributes {dimension_semantics = [#tpu.dimension_semantics<parallel>, #tpu.dimension_semantics<arbitrary>], iteration_bounds = array<i64: 2, 1>, scalar_prefetch = 0 : i64, scratch_operands = 1 : i64, tpu.core_type = #tpu.core_type<tc>, window_params = [{transform_indices = @transform_0, window_bounds = array<i64: 8, 32>}, {transform_indices = @transform_1, window_bounds = array<i64: 32, 128>}, {transform_indices = @transform_2, window_bounds = array<i64: 1, 128>}, {transform_indices = @transform_3, window_bounds = array<i64: 128, 32>}, {pipeline_mode = #tpu.pipeline_mode<synchronous>, transform_indices = @transform_4, window_bounds = array<i64: 1, 32>}, {transform_indices = @transform_5, window_bounds = array<i64: 8, 32>}]} {
    %c0_i32 = arith.constant 0 : i32
    %0 = arith.cmpi eq, %arg1, %c0_i32 : i32
    %1 = arith.extui %0 : i1 to i32
    %c0_i32_0 = arith.constant 0 : i32
    %2 = arith.cmpi ne, %1, %c0_i32_0 : i32
    scf.if %2 {
      %cst_19 = arith.constant 0.000000e+00 : f32
      %30 = vector.broadcast %cst_19 : f32 to vector<8x32xf32>
      %c0_20 = arith.constant 0 : index
      %c0_21 = arith.constant 0 : index
      %31 = vector.load %arg8[%c0_20, %c0_21] : memref<8x32xf32, #tpu.memory_space<vmem>>, vector<8x32xf32>
      tpu.vector_store %arg8[%c0_20, %c0_21], %30 {strides = array<i32>} : memref<8x32xf32, #tpu.memory_space<vmem>>, vector<8x32xf32>,
    } else {
    }
    %c0 = arith.constant 0 : index
    %c0_1 = arith.constant 0 : index
    %3 = vector.load %arg2[%c0, %c0_1] : memref<8x32xf32, #tpu.memory_space<vmem>>, vector<8x32xf32>
    %c0_2 = arith.constant 0 : index
    %c0_3 = arith.constant 0 : index
    %4 = vector.load %arg3[%c0_2, %c0_3] : memref<32x128xf32, #tpu.memory_space<vmem>>, vector<32x128xf32>
    %cst = arith.constant dense<0.000000e+00> : vector<8x128xf32>
    %5 = tpu.matmul %3, %4, %cst {dimension_numbers = #tpu.dot_dimension_numbers<[1], [0], [0], [1], [0, 0, 1, 1], [], []>} : vector<8x32xf32>, vector<32x128xf32>, vector<8x128xf32> -> vector<8x128xf32>
    %c0_4 = arith.constant 0 : index
    %c0_5 = arith.constant 0 : index
    %6 = vector.load %arg4[%c0_4, %c0_5] : memref<1x128xf32, #tpu.memory_space<vmem>>, vector<1x128xf32>
    %7 = vector.broadcast %6 : vector<1x128xf32> to vector<8x128xf32>
    %8 = arith.addf %5, %7 : vector<8x128xf32>
    %cst_6 = arith.constant 5.000000e-01 : f32
    %9 = vector.broadcast %cst_6 : f32 to vector<8x128xf32>
    %10 = arith.mulf %9, %8 : vector<8x128xf32>
    %cst_7 = arith.constant 4.471500e-02 : f32
    %11 = vector.broadcast %cst_7 : f32 to vector<8x128xf32>
    %12 = arith.mulf %11, %8 : vector<8x128xf32>
    %13 = arith.mulf %12, %8 : vector<8x128xf32>
    %14 = arith.mulf %13, %8 : vector<8x128xf32>
    %15 = arith.addf %8, %14 : vector<8x128xf32>
    %cst_8 = arith.constant 0.797884583 : f32
    %16 = vector.broadcast %cst_8 : f32 to vector<8x128xf32>
    %17 = arith.mulf %16, %15 : vector<8x128xf32>
    %18 = math.tanh %17 : vector<8x128xf32>
    %cst_9 = arith.constant 1.000000e+00 : f32
    %19 = vector.broadcast %cst_9 : f32 to vector<8x128xf32>
    %20 = arith.addf %19, %18 : vector<8x128xf32>
    %21 = arith.mulf %10, %20 : vector<8x128xf32>
    %c0_10 = arith.constant 0 : index
    %c0_11 = arith.constant 0 : index
    %22 = vector.load %arg8[%c0_10, %c0_11] : memref<8x32xf32, #tpu.memory_space<vmem>>, vector<8x32xf32>
    %c0_12 = arith.constant 0 : index
    %c0_13 = arith.constant 0 : index
    %23 = vector.load %arg5[%c0_12, %c0_13] : memref<128x32xf32, #tpu.memory_space<vmem>>, vector<128x32xf32>
    %cst_14 = arith.constant dense<0.000000e+00> : vector<8x32xf32>
    %24 = tpu.matmul %21, %23, %cst_14 {dimension_numbers = #tpu.dot_dimension_numbers<[1], [0], [0], [1], [0, 0, 1, 1], [], []>} : vector<8x128xf32>, vector<128x32xf32>, vector<8x32xf32> -> vector<8x32xf32>
    %25 = arith.addf %22, %24 : vector<8x32xf32>
    %c0_15 = arith.constant 0 : index
    %c0_16 = arith.constant 0 : index
    %26 = vector.load %arg8[%c0_15, %c0_16] : memref<8x32xf32, #tpu.memory_space<vmem>>, vector<8x32xf32>
    tpu.vector_store %arg8[%c0_15, %c0_16], %25 {strides = array<i32>} : memref<8x32xf32, #tpu.memory_space<vmem>>, vector<8x32xf32>,
    %c0_i32_17 = arith.constant 0 : i32
    %27 = arith.cmpi eq, %arg1, %c0_i32_17 : i32
    %28 = arith.extui %27 : i1 to i32
    %c0_i32_18 = arith.constant 0 : i32
    %29 = arith.cmpi ne, %28, %c0_i32_18 : i32
    scf.if %29 {
      %c0_19 = arith.constant 0 : index
      %c0_20 = arith.constant 0 : index
      %30 = vector.load %arg8[%c0_19, %c0_20] : memref<8x32xf32, #tpu.memory_space<vmem>>, vector<8x32xf32>
      %c0_21 = arith.constant 0 : index
      %c0_22 = arith.constant 0 : index
      %31 = vector.load %arg6[%c0_21, %c0_22] : memref<1x32xf32, #tpu.memory_space<vmem>>, vector<1x32xf32>
      %32 = vector.broadcast %31 : vector<1x32xf32> to vector<8x32xf32>
      %33 = arith.addf %30, %32 : vector<8x32xf32>
      %c0_23 = arith.constant 0 : index
      %c0_24 = arith.constant 0 : index
      %34 = vector.load %arg7[%c0_23, %c0_24] : memref<8x32xf32, #tpu.memory_space<vmem>>, vector<8x32xf32>
      tpu.vector_store %arg7[%c0_23, %c0_24], %33 {strides = array<i32>} : memref<8x32xf32, #tpu.memory_space<vmem>>, vector<8x32xf32>,
    } else {
    }
    return
  }
  func.func @transform_0(%arg0: i32, %arg1: i32) -> (i32, i32) {
    %c0_i32 = arith.constant 0 : i32
    %c0_i32_0 = arith.constant 0 : i32
    return %arg0, %c0_i32 : i32, i32
  }
  func.func @transform_1(%arg0: i32, %arg1: i32) -> (i32, i32) {
    %c0_i32 = arith.constant 0 : i32
    %c0_i32_0 = arith.constant 0 : i32
    return %c0_i32, %arg1 : i32, i32
  }
  func.func @transform_2(%arg0: i32, %arg1: i32) -> (i32, i32) {
    %c0_i32 = arith.constant 0 : i32
    %c0_i32_0 = arith.constant 0 : i32
    return %c0_i32, %arg1 : i32, i32
  }
  func.func @transform_3(%arg0: i32, %arg1: i32) -> (i32, i32) {
    %c0_i32 = arith.constant 0 : i32
    %c0_i32_0 = arith.constant 0 : i32
    return %arg1, %c0_i32 : i32, i32
  }
  func.func @transform_4(%arg0: i32, %arg1: i32) -> (i32, i32) {
    %c0_i32 = arith.constant 0 : i32
    %c0_i32_0 = arith.constant 0 : i32
    %c0_i32_1 = arith.constant 0 : i32
    return %c0_i32, %c0_i32_0 : i32, i32
  }
  func.func @transform_5(%arg0: i32, %arg1: i32) -> (i32, i32) {
    %c0_i32 = arith.constant 0 : i32
    %c0_i32_0 = arith.constant 0 : i32
    return %arg0, %c0_i32 : i32, i32
  }
}

</mosaic_0001>

<bundles_post_ra>
// kernel: tpu_custom_call.1
= control target key start
LH: loop header
LB: loop body
LE: loop exit
PB: predicated region body
PF: predicated region fallthrough
CT: control target
= control target key end

     0   :  { %10 = vsyncpa [#allocation4], 0  ;;  %s1058_s0 = inlined_call_operand.vmem [shape: f32[16,32], index: 0, kind: input, shape index: {}]   ;;  %s1059_s1 = inlined_call_operand.vmem [shape: f32[32,128], index: 1, kind: input, shape index: {}]   ;;  %s1060_s2 = inlined_call_operand.vmem [shape: f32[1,128], index: 2, kind: input, shape index: {}]   ;;  %s1061_s3 = inlined_call_operand.vmem [shape: f32[128,32], index: 3, kind: input, shape index: {}]   ;;  %s1062_s4 = inlined_call_operand.vmem [shape: f32[1,32], index: 4, kind: input, shape index: {}]   ;;  %s1063_s5 = inlined_call_operand.hbm [shape: f32[16,32], index: 5, kind: output, shape index: {}]  }
   0x1   :  { %12 = vsyncpa [#allocation4 + $0x1], 0  ;;  %s866_s18 = smov 0   ;;  %s868_s19 = smov 0  }
   0x2   :  { %s870_s20 = smov 0   ;;  %s872_s21 = smov 0  }
   0x3   :  { %s874_s22 = smov 0   ;;  %s876_s23 = smov 0  }
   0x4 LB: > { %s611_s24 = sadd.s32 4294967295, %s831_s23   ;;  %s612_s25 = sadd.s32 4294967294, %s831_s23   ;;  %s831_s23 = sphi %s876_s23, %s18_s23   ;;  %s827_s22 = sphi %s874_s22, %s1070_s22   ;;  %s823_s21 = sphi %s872_s21, %s1069_s21   ;;  %s819_s20 = sphi %s870_s20, %s1068_s20   ;;  %s815_s19 = sphi %s868_s19, %s1067_s19   ;;  %s811_s18 = sphi %s866_s18, %s1066_s18  }
   0x5   : > { %s30_s26 = sadd.s32 1, %s827_s22  ;;  %s162_s27 = sadd.s32 1, %s819_s20 }
   0x6   : > { %p32_p0 = scmp.ge.s32.totalorder %s30_s26, 2  ;;  %p172_p1 = scmp.ne.s32.totalorder %s819_s20, %s815_s19 }
   0x7   : > { %p173_p2 = scmp.eq.s32.totalorder %s611_s24, 1  ;;  %p178_p3 = scmp.ne.s32.totalorder %s815_s19, %s811_s18 }
   0x8   : > { %s1072_s26 = smov (%p32_p0, %s30_s26), 0  ;;  %p179_p5 = scmp.eq.s32.totalorder %s612_s25, 1 }
   0x9   : > { %p906_p4 = por %p173_p2, %p172_p1  ;;  %s159_s29 = ssub.s32 %s827_s22, %s1072_s26 }
   0xa   : > { %p618_p6 = scmp.ge.s32.totalorder %s831_s23, 1  ;;  %p160_p7 = scmp.eq.s32.totalorder %s159_s29, 0 }
   0xb   : > { %p913_p8 = por %p179_p5, %p178_p3  ;;  %p229_p9 = scmp.lt.s32.totalorder %s831_s23, 3 }
   0xc   : > { %s919_s6 = scalar_select %p160_p7, %s819_s20, %s162_s27  }
   0xd   : > { %p230_p10 = pnand %p618_p6, %p229_p9 }
   0xe   : > { %p268_p11 = scmp.lt.s32.totalorder (!%p230_p10), %s823_s21, 1  ;;  %s265_s9 = sand.u32 (!%p230_p10), 1, %s815_s19  }
   0xf   : > { %233 = sbr.rel (%p230_p10) target bundleno = 470 (0x1d6), region = 40  ;;  %s619_s10 = sshll.u32 (!%p230_p10), %s265_s9, 3 }
  0x10   : > { %s625_s13 = sshll.u32 (!%p230_p10), %s823_s21, 7  ;;  %s835_s29 = smov (!%p230_p10), [#allocation3]  }
  0x11   : > { %s500_s24 = scalar_lea.hbm (!%p230_p10), %s1063_s5, %s625_s13  ;;  %s759_s7 = sshll.u32 (!%p230_p10), %s835_s29, 4  ;;  %s760_s7 = int_to_ptr.vmem [resolvable:$false] %s759_s7 }
  0x14   : > { %v295_v0 = vld [vmem:[%s1059_s1 + $0x18] sm:$0xff]  ;;  %v833_v1 = vmov 0.0   ;;  %v294_v2 = vld [vmem:[%s1059_s1 + $0x10] sm:$0xff]  ;;  %vm834_vm0 = vmmov 0   ;;  %vm289_vm1 = vcmask 261120   ;;  %s269_s11 = scalar_select %p268_p11, %s823_s21, 1 }
  0x15   : > { %650 = vmatprep.subr.mxu0 %v833_v1  ;;  %658 = vmatprep.mubr.msk.f32.mxu0 %vm834_vm0, %v833_v1  ;;  %290 = vst.msk [vmem:[#allocation2] sm:$0xff] %vm289_vm1, %v833_v1  ;;  %v293_v3 = vld [vmem:[%s1059_s1 + $0x8] sm:$0xff]  ;;  %v292_v4 = vld [vmem:[%s1059_s1] sm:$0xff]  ;;  %v402_v6 = vld [vmem:[%s1061_s3 + $0x78] sm:$0xff]  ;;  %s761_s21 = scalar_lea.vmem %s760_s7, 256 }
  0x16   : > { %651 = vmatpush3.msra.mxu0 %v295_v0  ;;  %661 = vmatprep.subr.mxu1 %v833_v1  ;;  %s620_s14 = sshll.u32 %s269_s11, 3  ;;  %v401_v7 = vld [vmem:[%s1061_s3 + $0x70] sm:$0xff]  ;;  %v400_v8 = vld [vmem:[%s1061_s3 + $0x68] sm:$0xff]  ;;  %v399_v9 = vld [vmem:[%s1061_s3 + $0x60] sm:$0xff] }
  0x17   : > { %652 = vmatprep.subr.mxu0 %v833_v1  ;;  %693 = vmatprep.mubr.msk.f32.mxu1 %vm834_vm0, %v833_v1  ;;  %s271_s25 = scalar_lea.vmem %s1058_s0, %s620_s14  ;;  %v398_v10 = vld [vmem:[%s1061_s3 + $0x58] sm:$0xff]  ;;  %v397_v11 = vld [vmem:[%s1061_s3 + $0x50] sm:$0xff]  ;;  %v396_v12 = vld [vmem:[%s1061_s3 + $0x48] sm:$0xff]  ;;  %s267_s14 = scalar_lea.vmem [#allocation3], %s619_s10 }
  0x18   : > { %653 = vmatpush3.msra.mxu0 %v294_v2  ;;  %v291_v5 = vld [vmem:[%s271_s25] sm:$0xff]  ;;  %662 = vmatpush3.msra.mxu1 %v402_v6  ;;  %v394_v14 = vld [vmem:[%s1061_s3 + $0x38] sm:$0xff]  ;;  %v393_v15 = vld [vmem:[%s1061_s3 + $0x30] sm:$0xff]  ;;  %s502_s15 = sshll.u32 %s267_s14, 4  ;;  %s489_s25 = scalar_lea.sflag [#allocation4], %s265_s9  ;;  %s503_s15 = int_to_ptr.vmem [resolvable:$true] %s502_s15 }
  0x19   : > { %654 = vmatprep.subr.mxu0 %v833_v1  ;;  %663 = vmatprep.subr.mxu1 %v833_v1  ;;  %v395_v13 = vld [vmem:[%s1061_s3 + $0x40] sm:$0xff]  ;;  %v392_v16 = vld [vmem:[%s1061_s3 + $0x28] sm:$0xff]  ;;  %v390_v18 = vld [vmem:[%s1061_s3 + $0x18] sm:$0xff]  ;;  %s755_s27 = scalar_lea.vmem %s503_s15, 128  ;;  %p762_p1 = scmp.lt.s32.totalorder %s503_s15, %s760_s7 }
  0x1a   : > { %655 = vmatpush3.msra.mxu0 %v293_v3  ;;  %664 = vmatpush3.msra.mxu1 %v401_v7  ;;  %v391_v17 = vld [vmem:[%s1061_s3 + $0x20] sm:$0xff]  ;;  %v389_v19 = vld [vmem:[%s1061_s3 + $0x10] sm:$0xff]  ;;  %v388_v20 = vld [vmem:[%s1061_s3 + $0x8] sm:$0xff]  ;;  %p756_p12 = scmp.ne.s32.totalorder %s503_s15, %s755_s27  ;;  %p763_p2 = scmp.lt.s32.totalorder %s761_s21, %s755_s27 }
  0x1b   : > { %656 = vmatprep.subr.mxu0 %v833_v1  ;;  %665 = vmatprep.subr.mxu1 %v833_v1  ;;  %v387_v21 = vld [vmem:[%s1061_s3] sm:$0xff] }
  0x1c   : > { %657 = vmatpush3.msra.mxu0 %v292_v4  ;;  %666 = vmatpush3.msra.mxu1 %v400_v8  ;;  %v621_v22 = vld [vmem:[%s1060_s2] ss:$0 sm:$0xff]  ;;  %p757_p13 = pnand %p756_p12, %p906_p4  ;;  %p764_p3 = por %p763_p2, %p762_p1 }
  0x1d   : > { %659 = vmatmul.mubr.msk.f32.vlgmr.msra.gmra.mxu0 %vm289_vm1, %v291_v5  ;;  %667 = vmatprep.subr.mxu1 %v833_v1  ;;  %v386_v35 = vld [vmem:[#allocation2] sm:$0xff] }
  0x1e   : > { %668 = vmatpush3.msra.mxu1 %v399_v9  ;;  %v623_v39 = vld [vmem:[%s1062_s4] ss:$0 sm:$0xff]  ;;  %p758_p0 = pneg %p757_p13 }
  0x1f   : > { %669 = vmatprep.subr.mxu1 %v833_v1 }
  0x20   : > { %670 = vmatpush3.msra.mxu1 %v398_v10  ;;  %p765_p5 = pnand %p764_p3, %p758_p0 }
  0x21   : > { %671 = vmatprep.subr.mxu1 %v833_v1 }
  0x22   : > { %672 = vmatpush3.msra.mxu1 %v397_v11 }
  0x23   : > { %673 = vmatprep.subr.mxu1 %v833_v1 }
  0x24   : > { %674 = vmatpush3.msra.mxu1 %v396_v12 }
  0x25   : > { %675 = vmatprep.subr.mxu1 %v833_v1 }
  0x26   : > { %676 = vmatpush3.msra.mxu1 %v395_v13 }
  0x27   : > { %677 = vmatprep.subr.mxu1 %v833_v1 }
  0x28   : > { %678 = vmatpush3.msra.mxu1 %v394_v14 }
  0x29   : > { %679 = vmatprep.subr.mxu1 %v833_v1 }
  0x2a   : > { %680 = vmatpush3.msra.mxu1 %v393_v15 }
  0x2b   : > { %681 = vmatprep.subr.mxu1 %v833_v1 }
  0x2c   : > { %682 = vmatpush3.msra.mxu1 %v392_v16 }
  0x2d   : > { %683 = vmatprep.subr.mxu1 %v833_v1 }
  0x2e   : > { %684 = vmatpush3.msra.mxu1 %v391_v17 }
  0x2f   : > { %685 = vmatprep.subr.mxu1 %v833_v1 }
  0x30   : > { %686 = vmatpush3.msra.mxu1 %v390_v18 }
  0x31   : > { %687 = vmatprep.subr.mxu1 %v833_v1 }
  0x32   : > { %688 = vmatpush3.msra.mxu1 %v389_v19 }
  0x33   : > { %689 = vmatprep.subr.mxu1 %v833_v1 }
  0x34   : > { %690 = vmatpush3.msra.mxu1 %v388_v20 }
  0x35   : > { %691 = vmatprep.subr.mxu1 %v833_v1 }
  0x36   : > { %692 = vmatpush3.msra.mxu1 %v387_v21 }
  0xdd   : > { %v373_v23 = vpop.f32.mrf.mxu0 }
  0xde   : > { %v374_v24 = vadd.f32 %v621_v22, %v373_v23 }
  0xdf   : > { %v660_v25 = vpop.f32.mrf.mxu0 }
  0xe0   : > { %v378_v26 = vmul.f32 0.044715, %v374_v24  ;;  %v377_v32 = vmul.f32 0.5, %v374_v24 }
  0xe2   : > { %v379_v27 = vmul.f32 %v378_v26, %v374_v24 }
  0xe4   : > { %v380_v28 = vmul.f32 %v379_v27, %v374_v24 }
  0xe6   : > { %v381_v29 = vadd.f32 %v380_v28, %v374_v24 }
  0xe8   : > { %v382_v30 = vmul.f32 0.7978846, %v381_v29 }
  0xea   : > { %753 = vtanh.f32 %v382_v30 }
  0xf7   : > { %v754_v31 = vpop.eup %753 }
  0xf8   : > { %v384_v33 = vadd.f32 1.0, %v754_v31 }
  0xfa   : > { %v385_v34 = vmul.f32 %v384_v33, %v377_v32 }
  0xfc   : > { %694 = vmatmul.mubr.f32.vlgmr.msra.gmra.mxu1 %v385_v34 }
 0x1bc   : > { %v469_v36 = vpop.f32.mrf.mxu1 }
 0x1bd   : > { %v473_v37 = vadd.f32 %v469_v36, %v386_v35 }
 0x1be   : > { %v695_v38 = vpop.f32.mrf.mxu1 }
 0x1bf   : > { %474 = vst.msk [vmem:[#allocation2] sm:$0xff] %vm289_vm1, %v473_v37 }
 0x1c6   : > { %v478_v40 = vld [vmem:[#allocation2] sm:$0xff] }
 0x1c7   : > { %v486_v41 = vadd.f32 %v623_v39, %v478_v40 }
 0x1c9   : > { %487 = vst.msk [vmem:[%s267_s14] sm:$0xff] %vm289_vm1, %v486_v41 }
 0x1ca   : > { %768 = shalt.err (!%p765_p5)
}
 0x1cb   : > { %s769_s8 = scalar_lea.hbm %s500_s24, 128  ;;  %s773_s11 = scalar_lea.hbm %s1063_s5, 256 }
 0x1cc   : > { %p770_p6 = scmp.ne.s32.totalorder %s500_s24, %s769_s8  ;;  %p774_p10 = scmp.lt.s32.totalorder %s500_s24, %s1063_s5 }
 0x1cd   : > { %p775_p11 = scmp.lt.s32.totalorder %s773_s11, %s769_s8 }
 0x1ce   : > { %p771_p7 = pnand %p770_p6, %p906_p4 }
 0x1cf   : > { %p776_p12 = por %p775_p11, %p774_p10 }
 0x1d0   : > { %p772_p9 = pneg %p771_p7 }
 0x1d2   : > { %p777_p13 = pnand %p776_p12, %p772_p9 }
 0x1d4   : > { %780 = shalt.err (!%p777_p13)
}
 0x1d5   : > { %696 = dma.vmem_to_hbm [thread:$0]  (%p906_p4), %s503_s15, 128, %s500_s24, %s489_s25  }
 0x1d6 PF: > { %p702_p0 = scmp.ge.s32.totalorder %s831_s23, 2  ;;  %s514_s14 = sand.u32 1, %s811_s18  }
 0x1d7   : > { %s515_s16 = scalar_lea.sflag [#allocation4], %s514_s14 }
 0x1d8   : > { %p699_p1 = pnand %p702_p0, %p913_p8 }
 0x1da   : > { %p700_p2 = pneg %p699_p1 }
 0x1dc   : > { %806 = dma.done.wait (%p700_p2), %s515_s16, 128  }
 0x1dd   : > { %808 = vsyncadd (%p700_p2), %s515_s16, 4294967168  ;;  %s18_s23 = sadd.s32 1, %s831_s23   ;;  %s1066_s18 = smov %s815_s19 }
 0x1de   : > { %p15_p3 = scmp.ge.s32.totalorder %s18_s23, 4   ;;  %s1067_s19 = smov %s819_s20 }
 0x1df   : > { %s1068_s20 = smov %s919_s6  ;;  %s1069_s21 = smov %s827_s22 }
 0x1e0   : > { %s1070_s22 = smov %s1072_s26  ;;  %17 = sbr.rel (!%p15_p3) target bundleno = 4 (0x4), region = 92 }
 0x1e5   :  { %520 = vsyncpa [#allocation4], 1 }
 0x1e6   :  { %522 = vsyncpa [#allocation4 + $0x1], 1 }

</bundles_post_ra>
